<compile_context>
chip_gen: v7x
topology: tpu7x:2x2x1
jax: 0.10.0
libtpu: 0.0.40
codegen_flags: <defaults>
</compile_context>

<pallas_src>
import jax
import jax.numpy as jnp
from jax.experimental import pallas as pl
from jax.experimental.pallas import tpu as pltpu

NEG_SLOPE = 0.01  # PyTorch nn.LeakyReLU default


def _leaky_relu(v):
    return jnp.where(v > 0, v, NEG_SLOPE * v)


def _round_up(x, m):
    return ((x + m - 1) // m) * m


def _device_vmem_bytes():
    try:
        return int(pltpu.get_tpu_info().vmem_capacity_bytes)
    except Exception:
        return 64 * 1024 * 1024  # conservative (v7x)


def _num_tensorcores():
    try:
        kind = (jax.devices()[0].device_kind or "").lower()
    except Exception:
        return 1
    return 2 if "v7" in kind else 1  # v7x: 2 TCs/chip; v5e/v6e: 1


def _choose_block_m(n_rows, requested, num_cores):
    """Pick a batch tile: big (mem-bound regime), 128-aligned across tiles,
    and split into >= num_cores tiles only when there is enough work."""
    n8 = _round_up(max(n_rows, 1), 8)
    bm = max(_round_up(requested, 8), 8)
    bm = min(bm, n8)
    num_blocks = pl.cdiv(n8, bm)
    if num_cores > 1 and num_blocks < num_cores and n8 >= 128 * num_cores:
        num_blocks = num_cores
        bm = pl.cdiv(n8, num_blocks)
    # Multi-tile: keep tiles on clean 128-row boundaries; single-tile: 8-align
    # only (minimizes padded rows for ragged batches).
    align = 128 if (num_blocks > 1 and bm >= 128) else 8
    return _round_up(bm, align)


# ---------------------------------------------------------------------------
# Kernel: whole GateMLP forward for one batch tile (2 or 3 MXU dots).
# ---------------------------------------------------------------------------
def gate_mlp_kernel(x_ref, w1_ref, b1_ref, w2_ref, b2_ref, o_ref):
    # Cast to the MXU operand dtype in VMEM (no wrapper-side HBM astype pass).
    x = x_ref[...].astype(w1_ref.dtype)

    # Layer 1, both branches fused: [bm, in] @ [in, Hc] -> [bm, Hc]
    # (lanes 0..H-1 = ReLU-branch hidden, lanes H..2H-1 = sigmoid-branch).
    h = jnp.dot(x, w1_ref[...], preferred_element_type=jnp.float32)
    h = _leaky_relu(h + b1_ref[...])

    op = o_ref.shape[-1]              # per-branch padded width (multiple of 128)
    hc = h.astype(w2_ref.dtype)

    if len(w2_ref.shape) == 3:
        # Split mode (H % 128 == 0): two lane-aligned dots — half the MXU
        # flops and half the W2 bytes of the block-diagonal form.
        hh = w2_ref.shape[1]
        y_r = jnp.dot(hc[:, :hh], w2_ref[0], preferred_element_type=jnp.float32)
        y_s = jnp.dot(hc[:, hh:], w2_ref[1], preferred_element_type=jnp.float32)
    else:
        # Block-diagonal mode (small H): one dot, slice at the lane-aligned
        # per-branch output boundary.
        y = jnp.dot(hc, w2_ref[...], preferred_element_type=jnp.float32)
        y_r, y_s = y[:, :op], y[:, op:]

    y_r = _leaky_relu(y_r + b2_ref[:, :op])
    y_s = jax.nn.sigmoid(y_s + b2_ref[:, op:])
    o_ref[...] = (y_r * y_s).astype(o_ref.dtype)


# ---------------------------------------------------------------------------
# Wrapper-side weight packing (pure layout plumbing, done once).
# ---------------------------------------------------------------------------
def pack_gate_mlp_params(p, *, compute_dtype=jnp.float32):
    """Pack the 8 Linear tensors into 2 fused lane-dense weights + 2 biases.

    p holds pre-transposed weights: w1*: [in, H], w2*: [H, O], biases [1, *].
    compute_dtype may be bf16 on any chip (v5e MXU takes bf16 operands fine);
    biases and all elementwise math stay f32 inside the kernel.
    """
    w1r, w1s, w2r, w2s = p["w1r"], p["w1s"], p["w2r"], p["w2s"]
    b1r, b1s, b2r, b2s = p["b1r"], p["b1s"], p["b2r"], p["b2s"]
    in_dim, H = w1r.shape
    O = w2r.shape[1]
    Op = _round_up(O, 128)               # per-branch padded output width
    split = (H % 128 == 0)               # lane-aligned h slices possible?

    if split:
        Hc = 2 * H
        w2 = jnp.zeros((2, H, Op), jnp.float32)
        w2 = w2.at[0, :, :O].set(w2r).at[1, :, :O].set(w2s)
    else:
        Hc = _round_up(2 * H, 128)       # concatenated hidden width (lane-dense)
        w2 = jnp.zeros((Hc, 2 * Op), jnp.float32)
        w2 = w2.at[:H, :O].set(w2r).at[H:2 * H, Op:Op + O].set(w2s)

    w1 = jnp.zeros((in_dim, Hc), jnp.float32)
    w1 = w1.at[:, :H].set(w1r).at[:, H:2 * H].set(w1s)
    b1 = jnp.zeros((1, Hc), jnp.float32)
    b1 = b1.at[:, :H].set(b1r).at[:, H:2 * H].set(b1s)
    b2 = jnp.zeros((1, 2 * Op), jnp.float32)
    b2 = b2.at[:, :O].set(b2r).at[:, Op:Op + O].set(b2s)

    return dict(
        w1=w1.astype(compute_dtype), b1=b1,           # biases stay f32
        w2=w2.astype(compute_dtype), b2=b2,
        dims=(in_dim, H, O, Hc, Op),
        split=split,
        compute_dtype=compute_dtype,
    )


def gate_mlp(x, packed, *, block_m=512, out_dtype=None, slice_output=True):
    """x: [N, input_dim]. packed: output of pack_gate_mlp_params.

    slice_output=False returns the padded [n_pad, Op] slab (useful when
    stacking layers: keep the padded layout end-to-end, slice once at the end).
    """
    N, in_dim = x.shape
    in_dim_p, H, O, Hc, Op = packed["dims"]
    assert in_dim == in_dim_p, "input feature dim mismatch"
    compute_dtype = packed["compute_dtype"]
    out_dtype = x.dtype if out_dtype is None else out_dtype

    bm = _choose_block_m(N, block_m, _num_tensorcores())
    n_pad = _round_up(N, bm)
    if n_pad != N:  # ragged batch only; divisible batches take zero extra passes
        x = jnp.pad(x, ((0, n_pad - N), (0, 0)))
    grid = (n_pad // bm,)

    w1, b1, w2, b2 = packed["w1"], packed["b1"], packed["w2"], packed["b2"]

    # --- VMEM budget, clamped to physical capacity (v7x: 64 MiB). ------------
    w_is = jnp.dtype(compute_dtype).itemsize
    x_is = x.dtype.itemsize
    o_is = jnp.dtype(out_dtype).itemsize
    param_bytes = (w1.size + w2.size) * w_is + (b1.size + b2.size) * 4
    tile_bytes = bm * (in_dim * x_is + Op * o_is)
    live_bytes = bm * (Hc + 2 * Op) * (4 + w_is)     # f32 intermediates + casts
    cap = _device_vmem_bytes() - (2 << 20)           # headroom

    def _vmem_limit(weight_bufs):
        est = 2 * tile_bytes + weight_bufs * param_bytes + live_bytes
        return int(min(max(32 << 20, int(1.4 * est)), cap))

    # --- Cost hint for XLA scheduling around the GCN gather/scatter ops. -----
    l2_macs = (2 * H * Op) if packed["split"] else (Hc * 2 * Op)
    cost = pl.CostEstimate(
        flops=2 * n_pad * (in_dim * Hc + l2_macs),
        transcendentals=n_pad * Op,
        bytes_accessed=n_pad * in_dim * x_is + param_bytes + n_pad * Op * o_is,
    )

    def _build(single_buffer_weights):
        # Grid-invariant weights/biases: single-buffer them when supported.
        kw = {"pipeline_mode": pl.Buffered(1)} if single_buffer_weights else {}
        in_specs = [
            pl.BlockSpec((bm, in_dim), lambda i: (i, 0)),                 # x tile
            pl.BlockSpec(w1.shape, lambda i: (0, 0), **kw),               # W1
            pl.BlockSpec(b1.shape, lambda i: (0, 0), **kw),               # b1
            pl.BlockSpec(w2.shape, lambda i: (0,) * w2.ndim, **kw),       # W2
            pl.BlockSpec(b2.shape, lambda i: (0, 0), **kw),               # b2
        ]
        return pl.pallas_call(
            gate_mlp_kernel,
            out_shape=jax.ShapeDtypeStruct((n_pad, Op), out_dtype),
            grid_spec=pl.GridSpec(
                grid=grid,
                in_specs=in_specs,
                out_specs=pl.BlockSpec((bm, Op), lambda i: (i, 0)),       # lane-dense
            ),
            compiler_params=pltpu.CompilerParams(
                dimension_semantics=("parallel",),
                vmem_limit_bytes=_vmem_limit(1 if single_buffer_weights else 2),
            ),
            cost_estimate=cost,
        )

    try:
        out_padded = _build(True)(x, w1, b1, w2, b2)
    except Exception:
        # pl.Buffered(1) unsupported on this jax build -> default double-buffered
        # grid-invariant weight specs (correctness identical).
        out_padded = _build(False)(x, w1, b1, w2, b2)

    if slice_output:
        return out_padded[:N, :O]
    return out_padded


# ---------------------------------------------------------------------------
# Reference + deterministic init (nn.Linear-style uniform init, pre-transposed).
# ---------------------------------------------------------------------------
def init_params(key, input_dim, hidden_dim, output_dim):
    ks = jax.random.split(key, 8)

    def linear(kw, kb, fan_in, fan_out):
        bound = 1.0 / jnp.sqrt(jnp.float32(fan_in))
        w = jax.random.uniform(kw, (fan_in, fan_out), jnp.float32, -bound, bound)
        b = jax.random.uniform(kb, (1, fan_out), jnp.float32, -bound, bound)
        return w, b

    w1r, b1r = linear(ks[0], ks[1], input_dim, hidden_dim)
    w2r, b2r = linear(ks[2], ks[3], hidden_dim, output_dim)
    w1s, b1s = linear(ks[4], ks[5], input_dim, hidden_dim)
    w2s, b2s = linear(ks[6], ks[7], hidden_dim, output_dim)
    return dict(w1r=w1r, b1r=b1r, w2r=w2r, b2r=b2r,
                w1s=w1s, b1s=b1s, w2s=w2s, b2s=b2s)


def gate_mlp_ref(x, p):
    """Pure-JAX reference matching the PyTorch GateMLP forward exactly."""
    h_r = _leaky_relu(x @ p["w1r"] + p["b1r"])
    y_r = _leaky_relu(h_r @ p["w2r"] + p["b2r"])
    h_s = _leaky_relu(x @ p["w1s"] + p["b1s"])
    y_s = jax.nn.sigmoid(h_s @ p["w2s"] + p["b2s"])
    return y_r * y_s


if __name__ == "__main__":
    key = jax.random.PRNGKey(0)
    k_p, k_x, k_x2, k_p2, k_x3 = jax.random.split(key, 5)

    # GraphConvNet uses GateMLP(hidden, hidden, hidden); keep shapes small.
    hidden = 64
    params = init_params(k_p, hidden, hidden, hidden)
    x = jax.random.normal(k_x, (16, hidden), jnp.float32)
    ref = gate_mlp_ref(x, params)

    # f32 MXU operands, small H -> block-diagonal layer-2 path.
    packed_f32 = pack_gate_mlp_params(params, compute_dtype=jnp.float32)
    out = jax.block_until_ready(gate_mlp(x, packed_f32))
    assert out.shape == (16, hidden)
    assert jnp.allclose(out, ref, atol=1e-5, rtol=1e-5), "f32 mismatch vs reference"

    # Ragged, multi-tile batch: exercises row padding + >1 grid step.
    x2 = jax.random.normal(k_x2, (300, hidden), jnp.float32)
    out2 = jax.block_until_ready(gate_mlp(x2, packed_f32, block_m=128))
    assert out2.shape == (300, hidden)
    assert jnp.allclose(out2, gate_mlp_ref(x2, params), atol=1e-5, rtol=1e-5), \
        "ragged-batch mismatch"

    # Split-W2 path: hidden a multiple of 128 -> two lane-aligned second dots.
    hidden2 = 128
    params2 = init_params(k_p2, hidden2, hidden2, hidden2)
    x3 = jax.random.normal(k_x3, (64, hidden2), jnp.float32)
    packed2 = pack_gate_mlp_params(params2, compute_dtype=jnp.float32)
    out3 = jax.block_until_ready(gate_mlp(x3, packed2))
    assert out3.shape == (64, hidden2)
    assert jnp.allclose(out3, gate_mlp_ref(x3, params2), atol=1e-4, rtol=1e-4), \
        "split-mode mismatch"

    # bf16 MXU-operand path (any chip); accumulation/elementwise stay f32.
    packed_bf16 = pack_gate_mlp_params(params, compute_dtype=jnp.bfloat16)
    out_bf16 = jax.block_until_ready(gate_mlp(x, packed_bf16))
    assert jnp.allclose(out_bf16, ref, atol=5e-2, rtol=5e-2), "bf16 mismatch"

    print("KERNEL_OK")
</pallas_src>

<mosaic_0001>
module attributes {stable_mosaic.version = 11 : i64} {
  func.func @gate_mlp_kernel(%arg0: i32, %arg1: memref<16x64xf32, #tpu.memory_space<vmem>>, %arg2: memref<64x128xf32, #tpu.memory_space<vmem>>, %arg3: memref<1x128xf32, #tpu.memory_space<vmem>>, %arg4: memref<128x256xf32, #tpu.memory_space<vmem>>, %arg5: memref<1x256xf32, #tpu.memory_space<vmem>>, %arg6: memref<16x128xf32, #tpu.memory_space<vmem>>) attributes {dimension_semantics = [#tpu.dimension_semantics<parallel>], iteration_bounds = array<i64: 1>, scalar_prefetch = 0 : i64, scratch_operands = 0 : i64, tpu.core_type = #tpu.core_type<tc>, window_params = [{transform_indices = @transform_0, window_bounds = array<i64: 16, 64>}, {pipeline_mode = #tpu.pipeline_mode<synchronous>, transform_indices = @transform_1, window_bounds = array<i64: 64, 128>}, {pipeline_mode = #tpu.pipeline_mode<synchronous>, transform_indices = @transform_2, window_bounds = array<i64: 1, 128>}, {pipeline_mode = #tpu.pipeline_mode<synchronous>, transform_indices = @transform_3, window_bounds = array<i64: 128, 256>}, {pipeline_mode = #tpu.pipeline_mode<synchronous>, transform_indices = @transform_4, window_bounds = array<i64: 1, 256>}, {transform_indices = @transform_5, window_bounds = array<i64: 16, 128>}]} {
    %c0 = arith.constant 0 : index
    %c0_0 = arith.constant 0 : index
    %0 = vector.load %arg1[%c0, %c0_0] : memref<16x64xf32, #tpu.memory_space<vmem>>, vector<16x64xf32>
    %c0_1 = arith.constant 0 : index
    %c0_2 = arith.constant 0 : index
    %1 = vector.load %arg2[%c0_1, %c0_2] : memref<64x128xf32, #tpu.memory_space<vmem>>, vector<64x128xf32>
    %cst = arith.constant dense<0.000000e+00> : vector<16x128xf32>
    %2 = tpu.matmul %0, %1, %cst {dimension_numbers = #tpu.dot_dimension_numbers<[1], [0], [0], [1], [0, 0, 1, 1], [], []>} : vector<16x64xf32>, vector<64x128xf32>, vector<16x128xf32> -> vector<16x128xf32>
    %c0_3 = arith.constant 0 : index
    %c0_4 = arith.constant 0 : index
    %3 = vector.load %arg3[%c0_3, %c0_4] : memref<1x128xf32, #tpu.memory_space<vmem>>, vector<1x128xf32>
    %4 = vector.broadcast %3 : vector<1x128xf32> to vector<16x128xf32>
    %5 = arith.addf %2, %4 : vector<16x128xf32>
    %cst_5 = arith.constant 0.000000e+00 : f32
    %6 = vector.broadcast %cst_5 : f32 to vector<16x128xf32>
    %7 = arith.cmpf ogt, %5, %6 : vector<16x128xf32>
    %cst_6 = arith.constant 0.00999999977 : f32
    %8 = vector.broadcast %cst_6 : f32 to vector<16x128xf32>
    %9 = arith.mulf %8, %5 : vector<16x128xf32>
    %10 = arith.select %7, %5, %9 : vector<16x128xi1>, vector<16x128xf32>
    %c0_7 = arith.constant 0 : index
    %c0_8 = arith.constant 0 : index
    %11 = vector.load %arg4[%c0_7, %c0_8] : memref<128x256xf32, #tpu.memory_space<vmem>>, vector<128x256xf32>
    %cst_9 = arith.constant dense<0.000000e+00> : vector<16x256xf32>
    %12 = tpu.matmul %10, %11, %cst_9 {dimension_numbers = #tpu.dot_dimension_numbers<[1], [0], [0], [1], [0, 0, 1, 1], [], []>} : vector<16x128xf32>, vector<128x256xf32>, vector<16x256xf32> -> vector<16x256xf32>
    %13 = vector.extract_strided_slice %12 {offsets = [0, 0], sizes = [16, 128], strides = [1, 1]} : vector<16x256xf32> to vector<16x128xf32>
    %14 = vector.extract_strided_slice %12 {offsets = [0, 128], sizes = [16, 128], strides = [1, 1]} : vector<16x256xf32> to vector<16x128xf32>
    %c0_10 = arith.constant 0 : index
    %c0_11 = arith.constant 0 : index
    %15 = vector.load %arg5[%c0_10, %c0_11] : memref<1x256xf32, #tpu.memory_space<vmem>>, vector<1x128xf32>
    %16 = vector.broadcast %15 : vector<1x128xf32> to vector<16x128xf32>
    %17 = arith.addf %13, %16 : vector<16x128xf32>
    %cst_12 = arith.constant 0.000000e+00 : f32
    %18 = vector.broadcast %cst_12 : f32 to vector<16x128xf32>
    %19 = arith.cmpf ogt, %17, %18 : vector<16x128xf32>
    %cst_13 = arith.constant 0.00999999977 : f32
    %20 = vector.broadcast %cst_13 : f32 to vector<16x128xf32>
    %21 = arith.mulf %20, %17 : vector<16x128xf32>
    %22 = arith.select %19, %17, %21 : vector<16x128xi1>, vector<16x128xf32>
    %c0_14 = arith.constant 0 : index
    %c128 = arith.constant 128 : index
    %23 = vector.load %arg5[%c0_14, %c128] : memref<1x256xf32, #tpu.memory_space<vmem>>, vector<1x128xf32>
    %24 = vector.broadcast %23 : vector<1x128xf32> to vector<16x128xf32>
    %25 = arith.addf %14, %24 : vector<16x128xf32>
    %26 = arith.negf %25 : vector<16x128xf32>
    %27 = math.exp %26 : vector<16x128xf32>
    %cst_15 = arith.constant 1.000000e+00 : f32
    %28 = vector.broadcast %cst_15 : f32 to vector<16x128xf32>
    %29 = arith.addf %28, %27 : vector<16x128xf32>
    %30 = arith.divf %28, %29 : vector<16x128xf32>
    %31 = arith.mulf %22, %30 : vector<16x128xf32>
    %c0_16 = arith.constant 0 : index
    %c0_17 = arith.constant 0 : index
    %32 = vector.load %arg6[%c0_16, %c0_17] : memref<16x128xf32, #tpu.memory_space<vmem>>, vector<16x128xf32>
    tpu.vector_store %arg6[%c0_16, %c0_17], %31 {strides = array<i32>} : memref<16x128xf32, #tpu.memory_space<vmem>>, vector<16x128xf32>,
    return
  }
  func.func @transform_0(%arg0: i32) -> (i32, i32) {
    %c0_i32 = arith.constant 0 : i32
    %c0_i32_0 = arith.constant 0 : i32
    return %arg0, %c0_i32 : i32, i32
  }
  func.func @transform_1(%arg0: i32) -> (i32, i32) {
    %c0_i32 = arith.constant 0 : i32
    %c0_i32_0 = arith.constant 0 : i32
    %c0_i32_1 = arith.constant 0 : i32
    return %c0_i32, %c0_i32_0 : i32, i32
  }
  func.func @transform_2(%arg0: i32) -> (i32, i32) {
    %c0_i32 = arith.constant 0 : i32
    %c0_i32_0 = arith.constant 0 : i32
    %c0_i32_1 = arith.constant 0 : i32
    return %c0_i32, %c0_i32_0 : i32, i32
  }
  func.func @transform_3(%arg0: i32) -> (i32, i32) {
    %c0_i32 = arith.constant 0 : i32
    %c0_i32_0 = arith.constant 0 : i32
    %c0_i32_1 = arith.constant 0 : i32
    return %c0_i32, %c0_i32_0 : i32, i32
  }
  func.func @transform_4(%arg0: i32) -> (i32, i32) {
    %c0_i32 = arith.constant 0 : i32
    %c0_i32_0 = arith.constant 0 : i32
    %c0_i32_1 = arith.constant 0 : i32
    return %c0_i32, %c0_i32_0 : i32, i32
  }
  func.func @transform_5(%arg0: i32) -> (i32, i32) {
    %c0_i32 = arith.constant 0 : i32
    %c0_i32_0 = arith.constant 0 : i32
    return %arg0, %c0_i32 : i32, i32
  }
}

module attributes {stable_mosaic.version = 11 : i64} {
  func.func @gate_mlp_kernel(%arg0: i32, %arg1: memref<16x64xf32, #tpu.memory_space<vmem>>, %arg2: memref<64x128xf32, #tpu.memory_space<vmem>>, %arg3: memref<1x128xf32, #tpu.memory_space<vmem>>, %arg4: memref<128x256xf32, #tpu.memory_space<vmem>>, %arg5: memref<1x256xf32, #tpu.memory_space<vmem>>, %arg6: memref<16x128xf32, #tpu.memory_space<vmem>>) attributes {dimension_semantics = [#tpu.dimension_semantics<parallel>], iteration_bounds = array<i64: 1>, scalar_prefetch = 0 : i64, scratch_operands = 0 : i64, tpu.core_type = #tpu.core_type<tc>, window_params = [{transform_indices = @transform_0, window_bounds = array<i64: 16, 64>}, {pipeline_mode = #tpu.pipeline_mode<synchronous>, transform_indices = @transform_1, window_bounds = array<i64: 64, 128>}, {pipeline_mode = #tpu.pipeline_mode<synchronous>, transform_indices = @transform_2, window_bounds = array<i64: 1, 128>}, {pipeline_mode = #tpu.pipeline_mode<synchronous>, transform_indices = @transform_3, window_bounds = array<i64: 128, 256>}, {pipeline_mode = #tpu.pipeline_mode<synchronous>, transform_indices = @transform_4, window_bounds = array<i64: 1, 256>}, {transform_indices = @transform_5, window_bounds = array<i64: 16, 128>}]} {
    %c0 = arith.constant 0 : index
    %c0_0 = arith.constant 0 : index
    %0 = vector.load %arg1[%c0, %c0_0] : memref<16x64xf32, #tpu.memory_space<vmem>>, vector<16x64xf32>
    %c0_1 = arith.constant 0 : index
    %c0_2 = arith.constant 0 : index
    %1 = vector.load %arg2[%c0_1, %c0_2] : memref<64x128xf32, #tpu.memory_space<vmem>>, vector<64x128xf32>
    %cst = arith.constant dense<0.000000e+00> : vector<16x128xf32>
    %2 = tpu.matmul %0, %1, %cst {dimension_numbers = #tpu.dot_dimension_numbers<[1], [0], [0], [1], [0, 0, 1, 1], [], []>} : vector<16x64xf32>, vector<64x128xf32>, vector<16x128xf32> -> vector<16x128xf32>
    %c0_3 = arith.constant 0 : index
    %c0_4 = arith.constant 0 : index
    %3 = vector.load %arg3[%c0_3, %c0_4] : memref<1x128xf32, #tpu.memory_space<vmem>>, vector<1x128xf32>
    %4 = vector.broadcast %3 : vector<1x128xf32> to vector<16x128xf32>
    %5 = arith.addf %2, %4 : vector<16x128xf32>
    %cst_5 = arith.constant 0.000000e+00 : f32
    %6 = vector.broadcast %cst_5 : f32 to vector<16x128xf32>
    %7 = arith.cmpf ogt, %5, %6 : vector<16x128xf32>
    %cst_6 = arith.constant 0.00999999977 : f32
    %8 = vector.broadcast %cst_6 : f32 to vector<16x128xf32>
    %9 = arith.mulf %8, %5 : vector<16x128xf32>
    %10 = arith.select %7, %5, %9 : vector<16x128xi1>, vector<16x128xf32>
    %c0_7 = arith.constant 0 : index
    %c0_8 = arith.constant 0 : index
    %11 = vector.load %arg4[%c0_7, %c0_8] : memref<128x256xf32, #tpu.memory_space<vmem>>, vector<128x256xf32>
    %cst_9 = arith.constant dense<0.000000e+00> : vector<16x256xf32>
    %12 = tpu.matmul %10, %11, %cst_9 {dimension_numbers = #tpu.dot_dimension_numbers<[1], [0], [0], [1], [0, 0, 1, 1], [], []>} : vector<16x128xf32>, vector<128x256xf32>, vector<16x256xf32> -> vector<16x256xf32>
    %13 = vector.extract_strided_slice %12 {offsets = [0, 0], sizes = [16, 128], strides = [1, 1]} : vector<16x256xf32> to vector<16x128xf32>
    %14 = vector.extract_strided_slice %12 {offsets = [0, 128], sizes = [16, 128], strides = [1, 1]} : vector<16x256xf32> to vector<16x128xf32>
    %c0_10 = arith.constant 0 : index
    %c0_11 = arith.constant 0 : index
    %15 = vector.load %arg5[%c0_10, %c0_11] : memref<1x256xf32, #tpu.memory_space<vmem>>, vector<1x128xf32>
    %16 = vector.broadcast %15 : vector<1x128xf32> to vector<16x128xf32>
    %17 = arith.addf %13, %16 : vector<16x128xf32>
    %cst_12 = arith.constant 0.000000e+00 : f32
    %18 = vector.broadcast %cst_12 : f32 to vector<16x128xf32>
    %19 = arith.cmpf ogt, %17, %18 : vector<16x128xf32>
    %cst_13 = arith.constant 0.00999999977 : f32
    %20 = vector.broadcast %cst_13 : f32 to vector<16x128xf32>
    %21 = arith.mulf %20, %17 : vector<16x128xf32>
    %22 = arith.select %19, %17, %21 : vector<16x128xi1>, vector<16x128xf32>
    %c0_14 = arith.constant 0 : index
    %c128 = arith.constant 128 : index
    %23 = vector.load %arg5[%c0_14, %c128] : memref<1x256xf32, #tpu.memory_space<vmem>>, vector<1x128xf32>
    %24 = vector.broadcast %23 : vector<1x128xf32> to vector<16x128xf32>
    %25 = arith.addf %14, %24 : vector<16x128xf32>
    %26 = arith.negf %25 : vector<16x128xf32>
    %27 = math.exp %26 : vector<16x128xf32>
    %cst_15 = arith.constant 1.000000e+00 : f32
    %28 = vector.broadcast %cst_15 : f32 to vector<16x128xf32>
    %29 = arith.addf %28, %27 : vector<16x128xf32>
    %30 = arith.divf %28, %29 : vector<16x128xf32>
    %31 = arith.mulf %22, %30 : vector<16x128xf32>
    %c0_16 = arith.constant 0 : index
    %c0_17 = arith.constant 0 : index
    %32 = vector.load %arg6[%c0_16, %c0_17] : memref<16x128xf32, #tpu.memory_space<vmem>>, vector<16x128xf32>
    tpu.vector_store %arg6[%c0_16, %c0_17], %31 {strides = array<i32>} : memref<16x128xf32, #tpu.memory_space<vmem>>, vector<16x128xf32>,
    return
  }
  func.func @transform_0(%arg0: i32) -> (i32, i32) {
    %c0_i32 = arith.constant 0 : i32
    %c0_i32_0 = arith.constant 0 : i32
    return %arg0, %c0_i32 : i32, i32
  }
  func.func @transform_1(%arg0: i32) -> (i32, i32) {
    %c0_i32 = arith.constant 0 : i32
    %c0_i32_0 = arith.constant 0 : i32
    %c0_i32_1 = arith.constant 0 : i32
    return %c0_i32, %c0_i32_0 : i32, i32
  }
  func.func @transform_2(%arg0: i32) -> (i32, i32) {
    %c0_i32 = arith.constant 0 : i32
    %c0_i32_0 = arith.constant 0 : i32
    %c0_i32_1 = arith.constant 0 : i32
    return %c0_i32, %c0_i32_0 : i32, i32
  }
  func.func @transform_3(%arg0: i32) -> (i32, i32) {
    %c0_i32 = arith.constant 0 : i32
    %c0_i32_0 = arith.constant 0 : i32
    %c0_i32_1 = arith.constant 0 : i32
    return %c0_i32, %c0_i32_0 : i32, i32
  }
  func.func @transform_4(%arg0: i32) -> (i32, i32) {
    %c0_i32 = arith.constant 0 : i32
    %c0_i32_0 = arith.constant 0 : i32
    %c0_i32_1 = arith.constant 0 : i32
    return %c0_i32, %c0_i32_0 : i32, i32
  }
  func.func @transform_5(%arg0: i32) -> (i32, i32) {
    %c0_i32 = arith.constant 0 : i32
    %c0_i32_0 = arith.constant 0 : i32
    return %arg0, %c0_i32 : i32, i32
  }
}

</mosaic_0001>

<bundles_post_ra>
// kernel: tpu_custom_call.1
= control target key start
LH: loop header
LB: loop body
LE: loop exit
PB: predicated region body
PF: predicated region fallthrough
CT: control target
= control target key end

     0   :  { %10 = vsyncpa [#allocation3], 0  ;;  %s643_s0 = inlined_call_operand.hbm [shape: f32[16,64], index: 0, kind: input, shape index: {}]   ;;  %s644_s1 = inlined_call_operand.hbm [shape: f32[64,128], index: 1, kind: input, shape index: {}]   ;;  %s645_s2 = inlined_call_operand.vmem [shape: f32[1,128], index: 2, kind: input, shape index: {}]   ;;  %s646_s3 = inlined_call_operand.hbm [shape: f32[128,256], index: 3, kind: input, shape index: {}]   ;;  %s647_s4 = inlined_call_operand.vmem [shape: f32[1,256], index: 4, kind: input, shape index: {}]   ;;  %s648_s5 = inlined_call_operand.hbm [shape: f32[16,128], index: 5, kind: output, shape index: {}]  }
   0x1   :  { %11 = vsyncpa [#allocation6], 0 }
   0x2   :  { %12 = vsyncpa [#allocation4], 0  ;;  %s529_s18 = smov [#allocation5]   ;;  %s530_s20 = smov [#allocation2]  }
   0x3   :  { %s30_s19 = sshll.u32 %s529_s18, 4  ;;  %s18_s21 = sshll.u32 %s530_s20, 4  ;;  %s31_s19 = int_to_ptr.vmem [resolvable:$true] %s30_s19  ;;  %s568_s21 = int_to_ptr.vmem [resolvable:$true] %s18_s21 }
   0x4   :  { %s435_s24 = scalar_lea.hbm %s644_s1, 1024 }
   0x5   :  { %p436_p0 = scmp.ne.s32.totalorder %s644_s1, %s435_s24  ;;  %p439_p1 = scmp.lt.u32.totalorder %s435_s24, %s644_s1 }
   0x7   :  { %p441_p2 = pnand %p439_p1, %p436_p0 }
   0x9   :  { %444 = shalt.err (!%p441_p2)
}
   0xa   :  { %s445_s29 = scalar_lea.vmem %s31_s19, 1024  ;;  %p450_p4 = scmp.lt.s32.totalorder %s31_s19, %s31_s19 }
   0xb   :  { %p446_p3 = scmp.ne.s32.totalorder %s31_s19, %s445_s29  ;;  %p451_p5 = scmp.lt.s32.totalorder %s445_s29, %s445_s29 }
   0xd   :  { %p452_p6 = por %p451_p5, %p450_p4 }
   0xf   :  { %p453_p7 = pnand %p452_p6, %p446_p3 }
  0x11   :  { %456 = shalt.err (!%p453_p7)
}
  0x12   :  { %s531_s30 = smov 128   ;;  %s532_s6 = smov 8  }
  0x13   :  { %36 = dma.hbm_to_vmem [thread:$0]  %s644_s1, 1024, %s31_s19, [#allocation6], %s531_s30, %s531_s30, %s532_s6  }
  0x14   :  { %s457_s11 = scalar_lea.hbm %s643_s0, 256 }
  0x15   :  { %p458_p8 = scmp.ne.s32.totalorder %s643_s0, %s457_s11  ;;  %p461_p9 = scmp.lt.u32.totalorder %s457_s11, %s643_s0 }
  0x17   :  { %p463_p10 = pnand %p461_p9, %p458_p8 }
  0x19   :  { %466 = shalt.err (!%p463_p10)
}
  0x1a   :  { %s467_s16 = scalar_lea.vmem %s568_s21, 256  ;;  %p472_p12 = scmp.lt.s32.totalorder %s568_s21, %s568_s21 }
  0x1b   :  { %p468_p11 = scmp.ne.s32.totalorder %s568_s21, %s467_s16  ;;  %p473_p13 = scmp.lt.s32.totalorder %s467_s16, %s467_s16 }
  0x1d   :  { %p474_p0 = por %p473_p13, %p472_p12 }
  0x1f   :  { %p475_p1 = pnand %p474_p0, %p468_p11 }
  0x21   :  { %478 = shalt.err (!%p475_p1)
}
  0x22   :  { %24 = dma.hbm_to_vmem [thread:$0]  %s643_s0, 256, %s568_s21, [#allocation3], %s531_s30, %s531_s30, %s532_s6  }
  0x23   :  { %s533_s18 = smov [#allocation7]   ;;  %s479_s23 = scalar_lea.hbm %s646_s3, 4096 }
  0x24   :  { %s44_s19 = sshll.u32 %s533_s18, 4  ;;  %p480_p2 = scmp.ne.s32.totalorder %s646_s3, %s479_s23  ;;  %s45_s19 = int_to_ptr.vmem [resolvable:$true] %s44_s19 }
  0x25   :  { %p483_p3 = scmp.lt.u32.totalorder %s479_s23, %s646_s3 }
  0x27   :  { %p485_p4 = pnand %p483_p3, %p480_p2 }
  0x29   :  { %488 = shalt.err (!%p485_p4)
}
  0x2a   :  { %s489_s28 = scalar_lea.vmem %s45_s19, 4096  ;;  %p494_p6 = scmp.lt.s32.totalorder %s45_s19, %s45_s19 }
  0x2b   :  { %p490_p5 = scmp.ne.s32.totalorder %s45_s19, %s489_s28  ;;  %p495_p7 = scmp.lt.s32.totalorder %s489_s28, %s489_s28 }
  0x2d   :  { %p496_p8 = por %p495_p7, %p494_p6 }
  0x2f   :  { %p497_p9 = pnand %p496_p8, %p490_p5 }
  0x31   :  { %500 = shalt.err (!%p497_p9)
}
  0x32   :  { %s534_s0 = smov 256   ;;  %s535_s21 = smov 16  }
  0x33   :  { %50 = dma.hbm_to_vmem [thread:$0]  %s646_s3, 4096, %s45_s19, [#allocation6], %s534_s0, %s534_s0, %s535_s21  }
  0x34   :  { %523 = dma.done.wait [#allocation3], 256  }
  0x35   :  { %524 = vsyncadd [#allocation3], 4294967040 }
  0x36   :  { %525 = dma.done.wait [#allocation6], 5120  }
  0x37   :  { %526 = vsyncadd [#allocation6], 4294962176  ;;  %v64_v0 = vld [vmem:[#allocation5] sm:$0xff]  ;;  %v65_v1 = vld [vmem:[#allocation5 + $0x8] sm:$0xff]  ;;  %vm79_vm0 = vcmask 523264   ;;  %v536_v62 = vmov 0.0  }
  0x38   :  { %v66_v2 = vld [vmem:[#allocation5 + $0x10] sm:$0xff]  ;;  %v370_v3 = vpack.c.bf16 %v65_v1, %v64_v0  ;;  %v67_v4 = vld [vmem:[#allocation5 + $0x18] sm:$0xff]  ;;  %v68_v6 = vld [vmem:[#allocation5 + $0x20] sm:$0xff]  ;;  %263 = vmatprep.mubr.f32.mxu1 %v536_v62  ;;  %s537_s12 = smov [#allocation8]  }
  0x39   :  { %v374_v5 = vpack.c.bf16 %v67_v4, %v66_v2  ;;  %v69_v7 = vld [vmem:[#allocation5 + $0x28] sm:$0xff]  ;;  %v62_v8 = vld [vmem:[#allocation2] sm:$0xff]  ;;  %v170_v10 = vld [vmem:[#allocation7 + $0x18] sm:$0xff]  ;;  %s321_s13 = sshll.u32 %s537_s12, 4  ;;  %s322_s13 = int_to_ptr.vmem [resolvable:$true] %s321_s13 }
  0x3a   :  { %371 = vmatprep.subr.bf16.mxu0 %v370_v3  ;;  %367 = vmatprep.mubr.msk.f32.mxu0 %vm79_vm0, %v62_v8  ;;  %v168_v9 = vld [vmem:[#allocation7 + $0x8] sm:$0xff]  ;;  %v70_v11 = vld [vmem:[#allocation5 + $0x30] sm:$0xff]  ;;  %v167_v13 = vld [vmem:[#allocation7] sm:$0xff]  ;;  %v378_v16 = vpack.c.bf16 %v69_v7, %v68_v6  ;;  %p506_p11 = scmp.lt.s32.totalorder %s322_s13, %s322_s13 }
  0x3b   :  { %373 = vmatpush3.bf16.msra.mxu0 %v370_v3  ;;  %v386_v12 = vpack.c.bf16 %v170_v10, %v168_v9  ;;  %v169_v14 = vld [vmem:[#allocation7 + $0x10] sm:$0xff]  ;;  %v172_v15 = vld [vmem:[#allocation7 + $0x28] sm:$0xff]  ;;  %v174_v18 = vld [vmem:[#allocation7 + $0x38] sm:$0xff] }
  0x3c   :  { %375 = vmatprep.subr.bf16.mxu0 %v374_v5  ;;  %v388_v17 = vpack.c.bf16 %v169_v14, %v167_v13  ;;  %v171_v19 = vld [vmem:[#allocation7 + $0x20] sm:$0xff]  ;;  %v173_v20 = vld [vmem:[#allocation7 + $0x30] sm:$0xff]  ;;  %v71_v21 = vld [vmem:[#allocation5 + $0x38] sm:$0xff]  ;;  %v390_v22 = vpack.c.bf16 %v174_v18, %v172_v15 }
  0x3d   :  { %387 = vmatprep.subr.bf16.mxu1 %v386_v12  ;;  %v176_v23 = vld [vmem:[#allocation7 + $0x48] sm:$0xff]  ;;  %v178_v24 = vld [vmem:[#allocation7 + $0x58] sm:$0xff]  ;;  %v392_v25 = vpack.c.bf16 %v173_v20, %v171_v19  ;;  %v175_v27 = vld [vmem:[#allocation7 + $0x40] sm:$0xff]  ;;  %v382_v29 = vpack.c.bf16 %v71_v21, %v70_v11 }
  0x3e   :  { %389 = vmatpush1.bf16.msra.mxu1 %v388_v17  ;;  %v394_v26 = vpack.c.bf16 %v178_v24, %v176_v23  ;;  %v177_v28 = vld [vmem:[#allocation7 + $0x50] sm:$0xff]  ;;  %v180_v30 = vld [vmem:[#allocation7 + $0x68] sm:$0xff]  ;;  %v182_v31 = vld [vmem:[#allocation7 + $0x78] sm:$0xff] }
  0x3f   :  { %377 = vmatpush3.bf16.msra.mxu0 %v374_v5  ;;  %391 = vmatprep.subr.bf16.mxu1 %v390_v22  ;;  %v396_v32 = vpack.c.bf16 %v177_v28, %v175_v27  ;;  %v398_v33 = vpack.c.bf16 %v182_v31, %v180_v30  ;;  %v179_v34 = vld [vmem:[#allocation7 + $0x60] sm:$0xff]  ;;  %v181_v35 = vld [vmem:[#allocation7 + $0x70] sm:$0xff]  ;;  %v184_v36 = vld [vmem:[#allocation7 + $0x88] sm:$0xff] }
  0x40   :  { %379 = vmatprep.subr.bf16.mxu0 %v378_v16  ;;  %v186_v37 = vld [vmem:[#allocation7 + $0x98] sm:$0xff]  ;;  %v400_v38 = vpack.c.bf16 %v181_v35, %v179_v34  ;;  %v183_v41 = vld [vmem:[#allocation7 + $0x80] sm:$0xff]  ;;  %v185_v42 = vld [vmem:[#allocation7 + $0x90] sm:$0xff] }
  0x41   :  { %v63_v39 = vld [vmem:[#allocation2 + $0x8] sm:$0xff]  ;;  %v402_v40 = vpack.c.bf16 %v186_v37, %v184_v36  ;;  %v188_v43 = vld [vmem:[#allocation7 + $0xa8] sm:$0xff]  ;;  %v404_v45 = vpack.c.bf16 %v185_v42, %v183_v41  ;;  %v187_v47 = vld [vmem:[#allocation7 + $0xa0] sm:$0xff] }
  0x42   :  { %393 = vmatpush1.bf16.msra.mxu1 %v392_v25  ;;  %v190_v44 = vld [vmem:[#allocation7 + $0xb8] sm:$0xff]  ;;  %v189_v48 = vld [vmem:[#allocation7 + $0xb0] sm:$0xff]  ;;  %v192_v49 = vld [vmem:[#allocation7 + $0xc8] sm:$0xff] }
  0x43   :  { %381 = vmatpush3.bf16.msra.mxu0 %v378_v16  ;;  %395 = vmatprep.subr.bf16.mxu1 %v394_v26  ;;  %v406_v46 = vpack.c.bf16 %v190_v44, %v188_v43  ;;  %v194_v50 = vld [vmem:[#allocation7 + $0xd8] sm:$0xff]  ;;  %v408_v51 = vpack.c.bf16 %v189_v48, %v187_v47  ;;  %v191_v53 = vld [vmem:[#allocation7 + $0xc0] sm:$0xff]  ;;  %v193_v54 = vld [vmem:[#allocation7 + $0xd0] sm:$0xff] }
  0x44   :  { %383 = vmatprep.subr.bf16.mxu0 %v382_v29  ;;  %v410_v52 = vpack.c.bf16 %v194_v50, %v192_v49  ;;  %v412_v55 = vpack.c.bf16 %v193_v54, %v191_v53  ;;  %v196_v56 = vld [vmem:[#allocation7 + $0xe8] sm:$0xff]  ;;  %v198_v57 = vld [vmem:[#allocation7 + $0xf8] sm:$0xff]  ;;  %v195_v59 = vld [vmem:[#allocation7 + $0xe0] sm:$0xff] }
  0x45   :  { %v414_v58 = vpack.c.bf16 %v198_v57, %v196_v56  ;;  %v197_v60 = vld [vmem:[#allocation7 + $0xf0] sm:$0xff] }
  0x46   :  { %397 = vmatpush1.bf16.msra.mxu1 %v396_v32  ;;  %v416_v61 = vpack.c.bf16 %v197_v60, %v195_v59  ;;  %v334_v63 = vld [vmem:[%s645_s2] ss:$0 sm:$0xff]  ;;  %v338_v8 = vld [vmem:[%s647_s4 + $0x1] ss:$0 sm:$0xff] }
  0x47   :  { %385 = vmatpush3.bf16.msra.mxu0 %v382_v29  ;;  %399 = vmatprep.subr.bf16.mxu1 %v398_v33  ;;  %v337_v19 = vld [vmem:[%s647_s4] ss:$0 sm:$0xff]  ;;  %s501_s4 = scalar_lea.vmem %s322_s13, 256 }
  0x48   :  { %p502_p10 = scmp.ne.s32.totalorder %s322_s13, %s501_s4  ;;  %p507_p12 = scmp.lt.s32.totalorder %s501_s4, %s501_s4 }
  0x4a   :  { %368 = vmatmul.mubr.msk.f32.vlgmr.msra.gmra.mrb[0].mxu0 %vm79_vm0, %v63_v39  ;;  %401 = vmatpush1.bf16.msra.mxu1 %v400_v38  ;;  %p508_p13 = por %p507_p12, %p506_p11 }
  0x4b   :  { %403 = vmatprep.subr.bf16.mxu1 %v402_v40 }
  0x4c   :  { %p509_p0 = pnand %p508_p13, %p502_p10 }
  0x4e   :  { %405 = vmatpush1.bf16.msra.mxu1 %v404_v45 }
  0x4f   :  { %407 = vmatprep.subr.bf16.mxu1 %v406_v46 }
  0x52   :  { %409 = vmatpush1.bf16.msra.mxu1 %v408_v51 }
  0x53   :  { %411 = vmatprep.subr.bf16.mxu1 %v410_v52 }
  0x56   :  { %413 = vmatpush1.bf16.msra.mxu1 %v412_v55 }
  0x57   :  { %415 = vmatprep.subr.bf16.mxu1 %v414_v58 }
  0x5a   :  { %417 = vmatpush1.bf16.msra.mxu1 %v416_v61 }
 0x11d   :  { %v369_v0 = vpop.f32.mrb[0].mxu0 }
 0x11e   :  { %v152_v1 = vpop.f32.mrb[1].mxu0  ;;  %v158_v2 = vadd.f32 %v369_v0, %v334_v63 }
 0x11f   :  { %v153_v3 = vadd.f32 %v334_v63, %v152_v1 }
 0x120   :  { %v164_v5 = vmul.f32 0.01, %v158_v2  ;;  %vm162_vm2 = vcmp.gt.f32.partialorder %v158_v2, 0.0 }
 0x121   :  { %v163_v4 = vmul.f32 0.01, %v153_v3  ;;  %vm161_vm1 = vcmp.gt.f32.partialorder %v153_v3, 0.0 }
 0x122   :  { %v166_v7 = vsel %vm162_vm2, %v158_v2, %v164_v5 }
 0x123   :  { %v165_v6 = vsel %vm161_vm1, %v153_v3, %v163_v4 }
 0x124   :  { %264 = vmatmul.mubr.f32.vlgmr.msra.gmra.mrb[0].mxu1 %v165_v6 }
 0x125   :  { %269 = vmatprep.mubr.f32.mxu1 %v536_v62 }
 0x128   :  { %270 = vmatmul.mubr.f32.gmra.mrb[2].mxu1 %v166_v7 }
 0x1f7   :  { %v265_v9 = vpop.f32.mrb[0].mxu1 }
 0x1f8   :  { %v267_v10 = vpop.f32.mrb[1].mxu1  ;;  %v283_v21 = vadd.f32 %v337_v19, %v265_v9 }
 0x1f9   :  { %v298_v11 = vadd.f32 %v338_v8, %v267_v10 }
 0x1fa   :  { %v287_v23 = vmul.f32 0.01, %v283_v21  ;;  %vm285_vm3 = vcmp.gt.f32.partialorder %v283_v21, 0.0 }
 0x1fb   :  { %v339_v12 = vmul.f32 -1.442695, %v298_v11  ;;  %v271_v13 = vpop.f32.mrb[2].mxu1 }
 0x1fc   :  { %v273_v14 = vpop.f32.mrb[3].mxu1  ;;  %v284_v24 = vadd.f32 %v337_v19, %v271_v13  ;;  %v289_v26 = vsel %vm285_vm3, %v283_v21, %v287_v23 }
 0x1fd   :  { %427 = vpow2.f32 %v339_v12  ;;  %v299_v15 = vadd.f32 %v338_v8, %v273_v14 }
 0x1fe   :  { %v288_v27 = vmul.f32 0.01, %v284_v24  ;;  %vm286_vm4 = vcmp.gt.f32.partialorder %v284_v24, 0.0 }
 0x1ff   :  { %v340_v16 = vmul.f32 -1.442695, %v299_v15 }
 0x200   :  { %v290_v30 = vsel %vm286_vm4, %v284_v24, %v288_v27 }
 0x201   :  { %429 = vpow2.f32 %v340_v16 }
 0x207   :  { %v428_v17 = vpop.eup %427 }
 0x208   :  { %v306_v18 = vadd.f32 1.0, %v428_v17 }
 0x20a   :  { %431 = vrcp.f32 %v306_v18 }
 0x20b   :  { %v430_v20 = vpop.eup %429 }
 0x20c   :  { %v307_v22 = vadd.f32 1.0, %v430_v20 }
 0x20e   :  { %433 = vrcp.f32 %v307_v22 }
 0x214   :  { %v432_v25 = vpop.eup %431 }
 0x215   :  { %v312_v28 = vmul.f32 %v432_v25, %v289_v26 }
 0x217   :  { %314 = vst [vmem:[#allocation8] sm:$0xff] %v312_v28 }
 0x218   :  { %v434_v29 = vpop.eup %433 }
 0x219   :  { %v313_v31 = vmul.f32 %v434_v29, %v290_v30 }
 0x21b   :  { %315 = vst [vmem:[#allocation8 + $0x8] sm:$0xff] %v313_v31 }
 0x21c   :  { %512 = shalt.err (!%p509_p0)
}
 0x21d   :  { %s513_s16 = scalar_lea.hbm %s648_s5, 256 }
 0x21e   :  { %p514_p1 = scmp.ne.s32.totalorder %s648_s5, %s513_s16  ;;  %p517_p2 = scmp.lt.u32.totalorder %s513_s16, %s648_s5 }
 0x220   :  { %p519_p3 = pnand %p517_p2, %p514_p1 }
 0x222   :  { %522 = shalt.err (!%p519_p3)
}
 0x223   :  { %327 = dma.vmem_to_hbm [thread:$0]  %s322_s13, 256, %s648_s5, [#allocation4], %s531_s30, %s531_s30, %s532_s6  }
 0x224   :  { %527 = dma.done.wait [#allocation4], 256  }
 0x225   :  { %528 = vsyncadd [#allocation4], 4294967040 }
 0x226   :  { %331 = vsyncpa [#allocation3], 1 }
 0x227   :  { %332 = vsyncpa [#allocation6], 1 }
 0x228   :  { %333 = vsyncpa [#allocation4], 1 }

// kernel: tpu_custom_call.1
= control target key start
LH: loop header
LB: loop body
LE: loop exit
PB: predicated region body
PF: predicated region fallthrough
CT: control target
= control target key end

     0   :  { %10 = vsyncpa [#allocation3], 0  ;;  %s643_s0 = inlined_call_operand.hbm [shape: f32[16,64], index: 0, kind: input, shape index: {}]   ;;  %s644_s1 = inlined_call_operand.hbm [shape: f32[64,128], index: 1, kind: input, shape index: {}]   ;;  %s645_s2 = inlined_call_operand.vmem [shape: f32[1,128], index: 2, kind: input, shape index: {}]   ;;  %s646_s3 = inlined_call_operand.hbm [shape: f32[128,256], index: 3, kind: input, shape index: {}]   ;;  %s647_s4 = inlined_call_operand.vmem [shape: f32[1,256], index: 4, kind: input, shape index: {}]   ;;  %s648_s5 = inlined_call_operand.hbm [shape: f32[16,128], index: 5, kind: output, shape index: {}]  }
   0x1   :  { %11 = vsyncpa [#allocation6], 0 }
   0x2   :  { %12 = vsyncpa [#allocation4], 0  ;;  %s529_s18 = smov [#allocation5]   ;;  %s530_s20 = smov [#allocation2]  }
   0x3   :  { %s30_s19 = sshll.u32 %s529_s18, 4  ;;  %s18_s21 = sshll.u32 %s530_s20, 4  ;;  %s31_s19 = int_to_ptr.vmem [resolvable:$true] %s30_s19  ;;  %s568_s21 = int_to_ptr.vmem [resolvable:$true] %s18_s21 }
   0x4   :  { %s435_s24 = scalar_lea.hbm %s644_s1, 1024 }
   0x5   :  { %p436_p0 = scmp.ne.s32.totalorder %s644_s1, %s435_s24  ;;  %p439_p1 = scmp.lt.u32.totalorder %s435_s24, %s644_s1 }
   0x7   :  { %p441_p2 = pnand %p439_p1, %p436_p0 }
   0x9   :  { %444 = shalt.err (!%p441_p2)
}
   0xa   :  { %s445_s29 = scalar_lea.vmem %s31_s19, 1024  ;;  %p450_p4 = scmp.lt.s32.totalorder %s31_s19, %s31_s19 }
   0xb   :  { %p446_p3 = scmp.ne.s32.totalorder %s31_s19, %s445_s29  ;;  %p451_p5 = scmp.lt.s32.totalorder %s445_s29, %s445_s29 }
   0xd   :  { %p452_p6 = por %p451_p5, %p450_p4 }
   0xf   :  { %p453_p7 = pnand %p452_p6, %p446_p3 }
  0x11   :  { %456 = shalt.err (!%p453_p7)
}
  0x12   :  { %s531_s30 = smov 128   ;;  %s532_s6 = smov 8  }
  0x13   :  { %36 = dma.hbm_to_vmem [thread:$0]  %s644_s1, 1024, %s31_s19, [#allocation6], %s531_s30, %s531_s30, %s532_s6  }
  0x14   :  { %s457_s11 = scalar_lea.hbm %s643_s0, 256 }
  0x15   :  { %p458_p8 = scmp.ne.s32.totalorder %s643_s0, %s457_s11  ;;  %p461_p9 = scmp.lt.u32.totalorder %s457_s11, %s643_s0 }
  0x17   :  { %p463_p10 = pnand %p461_p9, %p458_p8 }
  0x19   :  { %466 = shalt.err (!%p463_p10)
}
  0x1a   :  { %s467_s16 = scalar_lea.vmem %s568_s21, 256  ;;  %p472_p12 = scmp.lt.s32.totalorder %s568_s21, %s568_s21 }
  0x1b   :  { %p468_p11 = scmp.ne.s32.totalorder %s568_s21, %s467_s16  ;;  %p473_p13 = scmp.lt.s32.totalorder %s467_s16, %s467_s16 }
  0x1d   :  { %p474_p0 = por %p473_p13, %p472_p12 }
  0x1f   :  { %p475_p1 = pnand %p474_p0, %p468_p11 }
  0x21   :  { %478 = shalt.err (!%p475_p1)
}
  0x22   :  { %24 = dma.hbm_to_vmem [thread:$0]  %s643_s0, 256, %s568_s21, [#allocation3], %s531_s30, %s531_s30, %s532_s6  }
  0x23   :  { %s533_s18 = smov [#allocation7]   ;;  %s479_s23 = scalar_lea.hbm %s646_s3, 4096 }
  0x24   :  { %s44_s19 = sshll.u32 %s533_s18, 4  ;;  %p480_p2 = scmp.ne.s32.totalorder %s646_s3, %s479_s23  ;;  %s45_s19 = int_to_ptr.vmem [resolvable:$true] %s44_s19 }
  0x25   :  { %p483_p3 = scmp.lt.u32.totalorder %s479_s23, %s646_s3 }
  0x27   :  { %p485_p4 = pnand %p483_p3, %p480_p2 }
  0x29   :  { %488 = shalt.err (!%p485_p4)
}
  0x2a   :  { %s489_s28 = scalar_lea.vmem %s45_s19, 4096  ;;  %p494_p6 = scmp.lt.s32.totalorder %s45_s19, %s45_s19 }
  0x2b   :  { %p490_p5 = scmp.ne.s32.totalorder %s45_s19, %s489_s28  ;;  %p495_p7 = scmp.lt.s32.totalorder %s489_s28, %s489_s28 }
  0x2d   :  { %p496_p8 = por %p495_p7, %p494_p6 }
  0x2f   :  { %p497_p9 = pnand %p496_p8, %p490_p5 }
  0x31   :  { %500 = shalt.err (!%p497_p9)
}
  0x32   :  { %s534_s0 = smov 256   ;;  %s535_s21 = smov 16  }
  0x33   :  { %50 = dma.hbm_to_vmem [thread:$0]  %s646_s3, 4096, %s45_s19, [#allocation6], %s534_s0, %s534_s0, %s535_s21  }
  0x34   :  { %523 = dma.done.wait [#allocation3], 256  }
  0x35   :  { %524 = vsyncadd [#allocation3], 4294967040 }
  0x36   :  { %525 = dma.done.wait [#allocation6], 5120  }
  0x37   :  { %526 = vsyncadd [#allocation6], 4294962176  ;;  %v64_v0 = vld [vmem:[#allocation5] sm:$0xff]  ;;  %v65_v1 = vld [vmem:[#allocation5 + $0x8] sm:$0xff]  ;;  %vm79_vm0 = vcmask 523264   ;;  %v536_v62 = vmov 0.0  }
  0x38   :  { %v66_v2 = vld [vmem:[#allocation5 + $0x10] sm:$0xff]  ;;  %v370_v3 = vpack.c.bf16 %v65_v1, %v64_v0  ;;  %v67_v4 = vld [vmem:[#allocation5 + $0x18] sm:$0xff]  ;;  %v68_v6 = vld [vmem:[#allocation5 + $0x20] sm:$0xff]  ;;  %263 = vmatprep.mubr.f32.mxu1 %v536_v62  ;;  %s537_s12 = smov [#allocation8]  }
  0x39   :  { %v374_v5 = vpack.c.bf16 %v67_v4, %v66_v2  ;;  %v69_v7 = vld [vmem:[#allocation5 + $0x28] sm:$0xff]  ;;  %v62_v8 = vld [vmem:[#allocation2] sm:$0xff]  ;;  %v170_v10 = vld [vmem:[#allocation7 + $0x18] sm:$0xff]  ;;  %s321_s13 = sshll.u32 %s537_s12, 4  ;;  %s322_s13 = int_to_ptr.vmem [resolvable:$true] %s321_s13 }
  0x3a   :  { %371 = vmatprep.subr.bf16.mxu0 %v370_v3  ;;  %367 = vmatprep.mubr.msk.f32.mxu0 %vm79_vm0, %v62_v8  ;;  %v168_v9 = vld [vmem:[#allocation7 + $0x8] sm:$0xff]  ;;  %v70_v11 = vld [vmem:[#allocation5 + $0x30] sm:$0xff]  ;;  %v167_v13 = vld [vmem:[#allocation7] sm:$0xff]  ;;  %v378_v16 = vpack.c.bf16 %v69_v7, %v68_v6  ;;  %p506_p11 = scmp.lt.s32.totalorder %s322_s13, %s322_s13 }
  0x3b   :  { %373 = vmatpush3.bf16.msra.mxu0 %v370_v3  ;;  %v386_v12 = vpack.c.bf16 %v170_v10, %v168_v9  ;;  %v169_v14 = vld [vmem:[#allocation7 + $0x10] sm:$0xff]  ;;  %v172_v15 = vld [vmem:[#allocation7 + $0x28] sm:$0xff]  ;;  %v174_v18 = vld [vmem:[#allocation7 + $0x38] sm:$0xff] }
  0x3c   :  { %375 = vmatprep.subr.bf16.mxu0 %v374_v5  ;;  %v388_v17 = vpack.c.bf16 %v169_v14, %v167_v13  ;;  %v171_v19 = vld [vmem:[#allocation7 + $0x20] sm:$0xff]  ;;  %v173_v20 = vld [vmem:[#allocation7 + $0x30] sm:$0xff]  ;;  %v71_v21 = vld [vmem:[#allocation5 + $0x38] sm:$0xff]  ;;  %v390_v22 = vpack.c.bf16 %v174_v18, %v172_v15 }
  0x3d   :  { %387 = vmatprep.subr.bf16.mxu1 %v386_v12  ;;  %v176_v23 = vld [vmem:[#allocation7 + $0x48] sm:$0xff]  ;;  %v178_v24 = vld [vmem:[#allocation7 + $0x58] sm:$0xff]  ;;  %v392_v25 = vpack.c.bf16 %v173_v20, %v171_v19  ;;  %v175_v27 = vld [vmem:[#allocation7 + $0x40] sm:$0xff]  ;;  %v382_v29 = vpack.c.bf16 %v71_v21, %v70_v11 }
  0x3e   :  { %389 = vmatpush1.bf16.msra.mxu1 %v388_v17  ;;  %v394_v26 = vpack.c.bf16 %v178_v24, %v176_v23  ;;  %v177_v28 = vld [vmem:[#allocation7 + $0x50] sm:$0xff]  ;;  %v180_v30 = vld [vmem:[#allocation7 + $0x68] sm:$0xff]  ;;  %v182_v31 = vld [vmem:[#allocation7 + $0x78] sm:$0xff] }
  0x3f   :  { %377 = vmatpush3.bf16.msra.mxu0 %v374_v5  ;;  %391 = vmatprep.subr.bf16.mxu1 %v390_v22  ;;  %v396_v32 = vpack.c.bf16 %v177_v28, %v175_v27  ;;  %v398_v33 = vpack.c.bf16 %v182_v31, %v180_v30  ;;  %v179_v34 = vld [vmem:[#allocation7 + $0x60] sm:$0xff]  ;;  %v181_v35 = vld [vmem:[#allocation7 + $0x70] sm:$0xff]  ;;  %v184_v36 = vld [vmem:[#allocation7 + $0x88] sm:$0xff] }
  0x40   :  { %379 = vmatprep.subr.bf16.mxu0 %v378_v16  ;;  %v186_v37 = vld [vmem:[#allocation7 + $0x98] sm:$0xff]  ;;  %v400_v38 = vpack.c.bf16 %v181_v35, %v179_v34  ;;  %v183_v41 = vld [vmem:[#allocation7 + $0x80] sm:$0xff]  ;;  %v185_v42 = vld [vmem:[#allocation7 + $0x90] sm:$0xff] }
  0x41   :  { %v63_v39 = vld [vmem:[#allocation2 + $0x8] sm:$0xff]  ;;  %v402_v40 = vpack.c.bf16 %v186_v37, %v184_v36  ;;  %v188_v43 = vld [vmem:[#allocation7 + $0xa8] sm:$0xff]  ;;  %v404_v45 = vpack.c.bf16 %v185_v42, %v183_v41  ;;  %v187_v47 = vld [vmem:[#allocation7 + $0xa0] sm:$0xff] }
  0x42   :  { %393 = vmatpush1.bf16.msra.mxu1 %v392_v25  ;;  %v190_v44 = vld [vmem:[#allocation7 + $0xb8] sm:$0xff]  ;;  %v189_v48 = vld [vmem:[#allocation7 + $0xb0] sm:$0xff]  ;;  %v192_v49 = vld [vmem:[#allocation7 + $0xc8] sm:$0xff] }
  0x43   :  { %381 = vmatpush3.bf16.msra.mxu0 %v378_v16  ;;  %395 = vmatprep.subr.bf16.mxu1 %v394_v26  ;;  %v406_v46 = vpack.c.bf16 %v190_v44, %v188_v43  ;;  %v194_v50 = vld [vmem:[#allocation7 + $0xd8] sm:$0xff]  ;;  %v408_v51 = vpack.c.bf16 %v189_v48, %v187_v47  ;;  %v191_v53 = vld [vmem:[#allocation7 + $0xc0] sm:$0xff]  ;;  %v193_v54 = vld [vmem:[#allocation7 + $0xd0] sm:$0xff] }
  0x44   :  { %383 = vmatprep.subr.bf16.mxu0 %v382_v29  ;;  %v410_v52 = vpack.c.bf16 %v194_v50, %v192_v49  ;;  %v412_v55 = vpack.c.bf16 %v193_v54, %v191_v53  ;;  %v196_v56 = vld [vmem:[#allocation7 + $0xe8] sm:$0xff]  ;;  %v198_v57 = vld [vmem:[#allocation7 + $0xf8] sm:$0xff]  ;;  %v195_v59 = vld [vmem:[#allocation7 + $0xe0] sm:$0xff] }
  0x45   :  { %v414_v58 = vpack.c.bf16 %v198_v57, %v196_v56  ;;  %v197_v60 = vld [vmem:[#allocation7 + $0xf0] sm:$0xff] }
  0x46   :  { %397 = vmatpush1.bf16.msra.mxu1 %v396_v32  ;;  %v416_v61 = vpack.c.bf16 %v197_v60, %v195_v59  ;;  %v334_v63 = vld [vmem:[%s645_s2] ss:$0 sm:$0xff]  ;;  %v338_v8 = vld [vmem:[%s647_s4 + $0x1] ss:$0 sm:$0xff] }
  0x47   :  { %385 = vmatpush3.bf16.msra.mxu0 %v382_v29  ;;  %399 = vmatprep.subr.bf16.mxu1 %v398_v33  ;;  %v337_v19 = vld [vmem:[%s647_s4] ss:$0 sm:$0xff]  ;;  %s501_s4 = scalar_lea.vmem %s322_s13, 256 }
  0x48   :  { %p502_p10 = scmp.ne.s32.totalorder %s322_s13, %s501_s4  ;;  %p507_p12 = scmp.lt.s32.totalorder %s501_s4, %s501_s4 }
  0x4a   :  { %368 = vmatmul.mubr.msk.f32.vlgmr.msra.gmra.mrb[0].mxu0 %vm79_vm0, %v63_v39  ;;  %401 = vmatpush1.bf16.msra.mxu1 %v400_v38  ;;  %p508_p13 = por %p507_p12, %p506_p11 }
  0x4b   :  { %403 = vmatprep.subr.bf16.mxu1 %v402_v40 }
  0x4c   :  { %p509_p0 = pnand %p508_p13, %p502_p10 }
  0x4e   :  { %405 = vmatpush1.bf16.msra.mxu1 %v404_v45 }
  0x4f   :  { %407 = vmatprep.subr.bf16.mxu1 %v406_v46 }
  0x52   :  { %409 = vmatpush1.bf16.msra.mxu1 %v408_v51 }
  0x53   :  { %411 = vmatprep.subr.bf16.mxu1 %v410_v52 }
  0x56   :  { %413 = vmatpush1.bf16.msra.mxu1 %v412_v55 }
  0x57   :  { %415 = vmatprep.subr.bf16.mxu1 %v414_v58 }
  0x5a   :  { %417 = vmatpush1.bf16.msra.mxu1 %v416_v61 }
 0x11d   :  { %v369_v0 = vpop.f32.mrb[0].mxu0 }
 0x11e   :  { %v152_v1 = vpop.f32.mrb[1].mxu0  ;;  %v158_v2 = vadd.f32 %v369_v0, %v334_v63 }
 0x11f   :  { %v153_v3 = vadd.f32 %v334_v63, %v152_v1 }
 0x120   :  { %v164_v5 = vmul.f32 0.01, %v158_v2  ;;  %vm162_vm2 = vcmp.gt.f32.partialorder %v158_v2, 0.0 }
 0x121   :  { %v163_v4 = vmul.f32 0.01, %v153_v3  ;;  %vm161_vm1 = vcmp.gt.f32.partialorder %v153_v3, 0.0 }
 0x122   :  { %v166_v7 = vsel %vm162_vm2, %v158_v2, %v164_v5 }
 0x123   :  { %v165_v6 = vsel %vm161_vm1, %v153_v3, %v163_v4 }
 0x124   :  { %264 = vmatmul.mubr.f32.vlgmr.msra.gmra.mrb[0].mxu1 %v165_v6 }
 0x125   :  { %269 = vmatprep.mubr.f32.mxu1 %v536_v62 }
 0x128   :  { %270 = vmatmul.mubr.f32.gmra.mrb[2].mxu1 %v166_v7 }
 0x1f7   :  { %v265_v9 = vpop.f32.mrb[0].mxu1 }
 0x1f8   :  { %v267_v10 = vpop.f32.mrb[1].mxu1  ;;  %v283_v21 = vadd.f32 %v337_v19, %v265_v9 }
 0x1f9   :  { %v298_v11 = vadd.f32 %v338_v8, %v267_v10 }
 0x1fa   :  { %v287_v23 = vmul.f32 0.01, %v283_v21  ;;  %vm285_vm3 = vcmp.gt.f32.partialorder %v283_v21, 0.0 }
 0x1fb   :  { %v339_v12 = vmul.f32 -1.442695, %v298_v11  ;;  %v271_v13 = vpop.f32.mrb[2].mxu1 }
 0x1fc   :  { %v273_v14 = vpop.f32.mrb[3].mxu1  ;;  %v284_v24 = vadd.f32 %v337_v19, %v271_v13  ;;  %v289_v26 = vsel %vm285_vm3, %v283_v21, %v287_v23 }
 0x1fd   :  { %427 = vpow2.f32 %v339_v12  ;;  %v299_v15 = vadd.f32 %v338_v8, %v273_v14 }
 0x1fe   :  { %v288_v27 = vmul.f32 0.01, %v284_v24  ;;  %vm286_vm4 = vcmp.gt.f32.partialorder %v284_v24, 0.0 }
 0x1ff   :  { %v340_v16 = vmul.f32 -1.442695, %v299_v15 }
 0x200   :  { %v290_v30 = vsel %vm286_vm4, %v284_v24, %v288_v27 }
 0x201   :  { %429 = vpow2.f32 %v340_v16 }
 0x207   :  { %v428_v17 = vpop.eup %427 }
 0x208   :  { %v306_v18 = vadd.f32 1.0, %v428_v17 }
 0x20a   :  { %431 = vrcp.f32 %v306_v18 }
 0x20b   :  { %v430_v20 = vpop.eup %429 }
 0x20c   :  { %v307_v22 = vadd.f32 1.0, %v430_v20 }
 0x20e   :  { %433 = vrcp.f32 %v307_v22 }
 0x214   :  { %v432_v25 = vpop.eup %431 }
 0x215   :  { %v312_v28 = vmul.f32 %v432_v25, %v289_v26 }
 0x217   :  { %314 = vst [vmem:[#allocation8] sm:$0xff] %v312_v28 }
 0x218   :  { %v434_v29 = vpop.eup %433 }
 0x219   :  { %v313_v31 = vmul.f32 %v434_v29, %v290_v30 }
 0x21b   :  { %315 = vst [vmem:[#allocation8 + $0x8] sm:$0xff] %v313_v31 }
 0x21c   :  { %512 = shalt.err (!%p509_p0)
}
 0x21d   :  { %s513_s16 = scalar_lea.hbm %s648_s5, 256 }
 0x21e   :  { %p514_p1 = scmp.ne.s32.totalorder %s648_s5, %s513_s16  ;;  %p517_p2 = scmp.lt.u32.totalorder %s513_s16, %s648_s5 }
 0x220   :  { %p519_p3 = pnand %p517_p2, %p514_p1 }
 0x222   :  { %522 = shalt.err (!%p519_p3)
}
 0x223   :  { %327 = dma.vmem_to_hbm [thread:$0]  %s322_s13, 256, %s648_s5, [#allocation4], %s531_s30, %s531_s30, %s532_s6  }
 0x224   :  { %527 = dma.done.wait [#allocation4], 256  }
 0x225   :  { %528 = vsyncadd [#allocation4], 4294967040 }
 0x226   :  { %331 = vsyncpa [#allocation3], 1 }
 0x227   :  { %332 = vsyncpa [#allocation6], 1 }
 0x228   :  { %333 = vsyncpa [#allocation4], 1 }

</bundles_post_ra>
